<compile_context>
chip_gen: v7x
topology: tpu7x:2x2x1
jax: 0.10.0
libtpu: 0.0.40
codegen_flags: <defaults>
</compile_context>

<pallas_src>
import jax
import jax.numpy as jnp
from jax.experimental import pallas as pl
from jax.experimental.pallas import tpu as pltpu


def _identity_dma_kernel(x_hbm, o_hbm, sem):
    # One whole-array HBM -> HBM async copy; start + wait.
    cp = pltpu.make_async_copy(x_hbm, o_hbm, sem)
    cp.start()
    cp.wait()


def _pallas_identity_copy(x: jax.Array) -> jax.Array:
    """Explicit device copy of x via a single HBM->HBM DMA (no VMEM staging)."""
    if x.size == 0:
        return x
    return pl.pallas_call(
        _identity_dma_kernel,
        out_shape=jax.ShapeDtypeStruct(x.shape, x.dtype),
        in_specs=[pl.BlockSpec(memory_space=pl.ANY)],
        out_specs=pl.BlockSpec(memory_space=pl.ANY),
        scratch_shapes=[pltpu.SemaphoreType.DMA],
        cost_estimate=pl.CostEstimate(
            flops=0, transcendentals=0, bytes_accessed=2 * x.nbytes
        ),
    )(x)


def resnet_bottleneck_forward(x: jax.Array, *, force_device_copy: bool = False) -> jax.Array:
    """Pallas implementation of ResNetBottleneck.forward (identity).

    Default path: return x unconditionally — the module has no parameters and
    no compute, so "do nothing" is the optimal kernel on all TPU generations.
    Set force_device_copy=True to route through the Pallas HBM->HBM DMA kernel
    (used for testing, or when a materialized copy is explicitly desired).
    """
    if not force_device_copy:
        return x
    return _pallas_identity_copy(x)


if __name__ == "__main__":
    key = jax.random.PRNGKey(0)
    x = jax.random.normal(key, (2, 4, 16, 16), dtype=jnp.float32)

    # Optimal (default) path: pure identity, no device round-trip.
    y_fast = resnet_bottleneck_forward(x)
    y_fast = jax.block_until_ready(y_fast)

    # Kernel path (exercised once so the Pallas DMA copy is compiled and run).
    y_kernel = resnet_bottleneck_forward(x, force_device_copy=True)
    y_kernel = jax.block_until_ready(y_kernel)

    assert y_fast.shape == x.shape and y_fast.dtype == x.dtype
    assert y_kernel.shape == x.shape and y_kernel.dtype == x.dtype
    assert bool(jnp.allclose(y_fast, x)), "identity (fast path) mismatch"
    assert bool(jnp.allclose(y_kernel, x)), "identity (DMA kernel path) mismatch"
    print("KERNEL_OK")
</pallas_src>

<mosaic_0001>
module attributes {stable_mosaic.version = 11 : i64} {
  func.func @_identity_dma_kernel(%arg0: memref<2x4x16x16xf32, #tpu.memory_space<any>>, %arg1: memref<2x4x16x16xf32, #tpu.memory_space<any>>, %arg2: memref<!tpu.dma_semaphore, #tpu.memory_space<semaphore_mem>>) attributes {dimension_semantics = [], scalar_prefetch = 0 : i64, scratch_operands = 1 : i64, tpu.core_type = #tpu.core_type<tc>} {
    tpu.enqueue_dma source(%arg0 : memref<2x4x16x16xf32, #tpu.memory_space<any>>) target(%arg1 : memref<2x4x16x16xf32, #tpu.memory_space<any>>) target_semaphore(%arg2 : memref<!tpu.dma_semaphore, #tpu.memory_space<semaphore_mem>>)
    tpu.wait_dma2 semaphore(%arg2 : memref<!tpu.dma_semaphore, #tpu.memory_space<semaphore_mem>>) src(%arg0 : memref<2x4x16x16xf32, #tpu.memory_space<any>>) dst(%arg1 : memref<2x4x16x16xf32, #tpu.memory_space<any>>)
    return
  }
}

</mosaic_0001>

<bundles_post_ra>
// kernel: tpu_custom_call.1
= control target key start
LH: loop header
LB: loop body
LE: loop exit
PB: predicated region body
PF: predicated region fallthrough
CT: control target
= control target key end

     0   :  { %s36_s6 = smov [#allocation2]   ;;  %s37_s7 = smov [#allocation3]   ;;  %s55_s0 = inlined_call_operand.hbm [shape: f32[2,4,16,16], index: 0, kind: input, shape index: {}]   ;;  %s56_s1 = inlined_call_operand.hbm [shape: f32[2,4,16,16], index: 1, kind: output, shape index: {}]  }
   0x1   :  { %s38_s8 = smov 0  }
   0x2   :  { %18 = dma.general %s55_s0, 2048, %s56_s1, %s36_s6, %s37_s7, [#allocation4], %s38_s8, 0  }
   0x3   :  { %34 = dma.done.wait [#allocation2], 2048 }
   0x4   :  { %35 = vsyncadd [#allocation2], 4294965248 }
   0x5   :  { %24 = vsyncmov [#allocation2] }
   0x8   :  { %s25_s13 = vpop.sfrf %24 }
   0x9   :  { %p30_p0 = scmp.ne.s32.totalorder %s25_s13, 0 }
   0xb   :  { %29 = shalt.err (%p30_p0)  }

</bundles_post_ra>
